<compile_context>
chip_gen: v7x
topology: tpu7x:2x2x1
jax: 0.10.0
libtpu: 0.0.40
codegen_flags: <defaults>
</compile_context>

<pallas_src>
import functools

import jax
import jax.numpy as jnp
from jax.experimental import pallas as pl
from jax.experimental.pallas import tpu as pltpu


def _round_up(x, m):
    return (x + m - 1) // m * m


def _pick_heads_per_block(num_heads, head_dim):
    """Largest divisor Hb of num_heads with Hb*head_dim <= 256 (MXU contraction)."""
    best = 1
    for hb in range(1, num_heads + 1):
        if num_heads % hb == 0 and hb * head_dim <= 256:
            best = hb
    return best


def attention_kernel(x_ref, wqkv_ref, bqkv_ref, wproj_ref, bproj_ref, o_ref,
                     acc_ref, *, heads_per_block, head_dim, seq_len):
    """Grid point = (batch element, head block).

    x_ref     : (1, Np, C)          input tokens (Np = padded N)
    wqkv_ref  : (HB, C, 3*Hb*D)     resident packed [Wq*scale | Wk | Wv] per block
    bqkv_ref  : (HB, 1, 3*Hb*D) f32 resident packed [bq*scale | 0 | bv] per block
    wproj_ref : (HB, Hb*D, C)       resident output-projection rows per block
    bproj_ref : (1, C) f32          output-projection bias
    o_ref     : (1, Np, C)          output tokens (written on the last block)
    acc_ref   : (Np, C) f32         accumulator scratch (persists across blocks)
    """
    D = head_dim
    Hb = heads_per_block
    HbD = Hb * D
    hb = pl.program_id(1)

    x = x_ref[0]                      # (Np, C), input dtype (bf16 stays bf16)
    dt = x.dtype
    Np = x.shape[0]

    # Fused QKV projection for this head block (MXU, f32 accumulation).
    qkv = jnp.dot(x, wqkv_ref[hb], preferred_element_type=jnp.float32)
    qkv = qkv + bqkv_ref[hb]          # (Np, 3*Hb*D) f32

    # Cheap (1, Np) additive mask for the padded key columns (static branch).
    if seq_len < Np:
        col = jax.lax.broadcasted_iota(jnp.int32, (1, Np), 1)
        key_mask = jnp.where(col < seq_len, jnp.float32(0.0), jnp.float32(-1e30))
    else:
        key_mask = None

    # Per-head attention inside the block (static unrolled loop).
    ctx_parts = []
    for i in range(Hb):
        q = qkv[:, 0 * HbD + i * D:0 * HbD + (i + 1) * D].astype(dt)
        k = qkv[:, 1 * HbD + i * D:1 * HbD + (i + 1) * D].astype(dt)
        v = qkv[:, 2 * HbD + i * D:2 * HbD + (i + 1) * D].astype(dt)

        # q @ k^T without an explicit transpose: contract last dim vs last dim.
        s = jax.lax.dot_general(q, k, (((1,), (1,)), ((), ())),
                                preferred_element_type=jnp.float32)   # (Np, Np)
        if key_mask is not None:
            s = s + key_mask

        # Numerically-stable softmax in f32; EUP approx reciprocal for the norm.
        s = s - jnp.max(s, axis=-1, keepdims=True)
        p = jnp.exp(s)
        p = p * pl.reciprocal(jnp.sum(p, axis=-1, keepdims=True), approx=True)

        ctx_parts.append(jnp.dot(p.astype(dt), v,
                                 preferred_element_type=jnp.float32))  # (Np, D)

    ctx = ctx_parts[0] if Hb == 1 else jnp.concatenate(ctx_parts, axis=-1)

    # Head-merge fused into the output projection: one (Np, HbD) @ (HbD, C).
    contrib = jnp.dot(ctx.astype(dt), wproj_ref[hb],
                      preferred_element_type=jnp.float32)              # (Np, C)

    @pl.when(hb == 0)
    def _first():
        # Write-through with the proj bias folded in (no zero-fill + add).
        acc_ref[...] = contrib + bproj_ref[...]

    @pl.when(hb > 0)
    def _accumulate():
        acc_ref[...] += contrib

    @pl.when(hb == pl.num_programs(1) - 1)
    def _finalize():
        o_ref[0] = acc_ref[...].astype(o_ref.dtype)


def prepare_attention_params(qkv_weight, q_bias, v_bias, proj_weight, proj_bias,
                             num_heads, head_dim, heads_per_block, param_dtype):
    """One-time parameter repacking (run once per model, not per forward call).

    torch.nn.Linear layouts: qkv_weight (3A, C), proj_weight (C, A), A = H*D.
    Returns (wqkv_h, bqkv_h, wproj_h, bproj) packed per head block.
    """
    H, D, Hb = num_heads, head_dim, heads_per_block
    HB = H // Hb
    A = H * D
    C = qkv_weight.shape[1]
    scale = D ** (-0.5)

    # Scale is applied in f32 BEFORE the compute-dtype cast (bit-closeness).
    wqkv_t = jnp.transpose(qkv_weight.astype(jnp.float32))        # (C, 3A)
    wq = wqkv_t[:, 0 * A:1 * A] * scale
    wk = wqkv_t[:, 1 * A:2 * A]
    wv = wqkv_t[:, 2 * A:3 * A]

    def group_w(w):                                               # (C, A) -> (HB, C, Hb*D)
        return jnp.transpose(w.reshape(C, HB, Hb * D), (1, 0, 2))

    wqkv_h = jnp.concatenate([group_w(wq), group_w(wk), group_w(wv)],
                             axis=-1).astype(param_dtype)         # (HB, C, 3*Hb*D)

    if q_bias is not None:
        bq = q_bias.astype(jnp.float32) * scale
        bv = v_bias.astype(jnp.float32)
    else:
        bq = jnp.zeros((A,), jnp.float32)
        bv = jnp.zeros((A,), jnp.float32)
    bk = jnp.zeros((A,), jnp.float32)

    def group_b(b):                                               # (A,) -> (HB, 1, Hb*D)
        return b.reshape(HB, 1, Hb * D)

    bqkv_h = jnp.concatenate([group_b(bq), group_b(bk), group_b(bv)],
                             axis=-1)                             # (HB, 1, 3*Hb*D) f32

    wproj_h = jnp.transpose(proj_weight.astype(jnp.float32)) \
        .reshape(HB, Hb * D, C).astype(param_dtype)               # (HB, Hb*D, C)
    bproj = proj_bias.astype(jnp.float32).reshape(1, C)           # (1, C) f32
    return wqkv_h, bqkv_h, wproj_h, bproj


def attention_forward(x, packed_params, *, num_heads, head_dim, heads_per_block):
    """x: (B, N, C) -> (B, N, C) using pre-packed params."""
    wqkv_h, bqkv_h, wproj_h, bproj = packed_params
    B, N, C = x.shape
    H, D, Hb = num_heads, head_dim, heads_per_block
    HB = H // Hb
    HbD = Hb * D
    A = H * D
    dt = x.dtype
    isz = jnp.dtype(dt).itemsize

    # Pad N: dtype-aware sublane multiple; lane-dense 128 for longer sequences.
    sub = 16 if dt == jnp.bfloat16 else 8
    Np = _round_up(N, 128) if N >= 128 else _round_up(N, sub)
    x_p = x if Np == N else jnp.pad(x, ((0, 0), (0, Np - N), (0, 0)))

    # ---- VMEM budget from the real working set, clamped per generation -----
    weight_bytes = (HB * C * 3 * HbD) * isz + (HB * 3 * HbD) * 4 \
        + (HB * HbD * C) * isz + C * 4
    ws = (2 * Np * C * isz                       # x (double-buffered)
          + 2 * Np * C * isz                     # out (double-buffered)
          + 2 * weight_bytes                     # resident weights (worst case 2 bufs)
          + Np * C * 4                           # f32 accumulator scratch
          + Np * 3 * HbD * (4 + isz)             # qkv f32 + casted q/k/v
          + 2 * Np * Np * (4 + isz)              # score + prob (+ bf16 cast)
          + Np * HbD * (4 + isz))                # ctx
    try:
        cap = int(pltpu.get_tpu_info().vmem_capacity_bytes)
    except Exception:
        cap = 64 * 1024 * 1024                   # conservative (v7x per-TC)
    vmem_limit = int(min(max(ws + (4 << 20), 16 << 20), (cap * 3) // 4))

    # Advisory cost estimate so XLA can overlap neighbours around the call.
    flops = int(B * (2 * Np * C * 3 * A + 4 * H * Np * Np * D + 2 * Np * A * C))
    cost = pl.CostEstimate(
        flops=flops,
        transcendentals=int(B * H * Np * Np),
        bytes_accessed=int(2 * B * Np * C * isz + weight_bytes))

    kernel = functools.partial(attention_kernel, heads_per_block=Hb,
                               head_dim=D, seq_len=N)

    out_p = pl.pallas_call(
        kernel,
        out_shape=jax.ShapeDtypeStruct((B, Np, C), dt),
        grid_spec=pltpu.PrefetchScalarGridSpec(
            num_scalar_prefetch=0,
            grid=(B, HB),                         # head block = reduction axis, last
            in_specs=[
                # x: resident over the head-block axis for each batch element.
                pl.BlockSpec((1, Np, C), lambda b, h: (b, 0, 0)),
                # Weights/biases: constant index_map -> DMA'd once, VMEM-resident.
                pl.BlockSpec((HB, C, 3 * HbD), lambda b, h: (0, 0, 0)),
                pl.BlockSpec((HB, 1, 3 * HbD), lambda b, h: (0, 0, 0)),
                pl.BlockSpec((HB, HbD, C), lambda b, h: (0, 0, 0)),
                pl.BlockSpec((1, C), lambda b, h: (0, 0)),
            ],
            out_specs=pl.BlockSpec((1, Np, C), lambda b, h: (b, 0, 0)),
            scratch_shapes=[pltpu.VMEM((Np, C), jnp.float32)],
        ),
        compiler_params=pltpu.CompilerParams(
            dimension_semantics=("parallel", "arbitrary"),
            vmem_limit_bytes=vmem_limit),
        cost_estimate=cost,
    )(x_p, wqkv_h, bqkv_h, wproj_h, bproj)

    return out_p if Np == N else out_p[:, :N, :]


def attention_pallas(x, qkv_weight, q_bias, v_bias, proj_weight, proj_bias,
                     num_heads, head_dim):
    """Convenience wrapper (repacks params per call; hoist prepare_* in a model)."""
    Hb = _pick_heads_per_block(num_heads, head_dim)
    packed = prepare_attention_params(qkv_weight, q_bias, v_bias, proj_weight,
                                      proj_bias, num_heads, head_dim, Hb, x.dtype)
    return attention_forward(x, packed, num_heads=num_heads, head_dim=head_dim,
                             heads_per_block=Hb)


def attention_reference(x, qkv_weight, q_bias, v_bias, proj_weight, proj_bias,
                        num_heads, head_dim):
    """Pure-JAX mirror of the PyTorch forward for correctness checking."""
    B, N, C = x.shape
    A = num_heads * head_dim
    scale = head_dim ** (-0.5)
    if q_bias is not None:
        bias = jnp.concatenate([q_bias, jnp.zeros_like(v_bias), v_bias])
    else:
        bias = jnp.zeros((3 * A,), x.dtype)
    qkv = x @ qkv_weight.T + bias                                   # (B, N, 3A)
    qkv = qkv.reshape(B, N, 3, num_heads, head_dim).transpose(2, 0, 3, 1, 4)
    q, k, v = qkv[0], qkv[1], qkv[2]                                # (B, H, N, D)
    q = q * scale
    attn = jax.nn.softmax(jnp.einsum('bhnd,bhmd->bhnm', q, k), axis=-1)
    out = jnp.einsum('bhnm,bhmd->bhnd', attn, v)
    out = out.transpose(0, 2, 1, 3).reshape(B, N, A)
    return out @ proj_weight.T + proj_bias


if __name__ == "__main__":
    B, N, C = 2, 8, 32
    num_heads = 4
    head_dim = C // num_heads            # attn_head_dim=None -> dim // num_heads
    A = num_heads * head_dim

    key = jax.random.PRNGKey(0)
    kx, kw1, kb1q, kb1v, kw2, kb2 = jax.random.split(key, 6)

    x = jax.random.normal(kx, (B, N, C), dtype=jnp.float32)
    # nn.Linear-shaped parameters (deterministic synthetic init)
    qkv_weight = jax.random.normal(kw1, (3 * A, C), dtype=jnp.float32) * 0.05
    q_bias = jax.random.normal(kb1q, (A,), dtype=jnp.float32) * 0.05   # qkv_bias=True
    v_bias = jax.random.normal(kb1v, (A,), dtype=jnp.float32) * 0.05
    proj_weight = jax.random.normal(kw2, (C, A), dtype=jnp.float32) * 0.05
    proj_bias = jax.random.normal(kb2, (C,), dtype=jnp.float32) * 0.05

    out = attention_pallas(x, qkv_weight, q_bias, v_bias, proj_weight,
                           proj_bias, num_heads, head_dim)
    out = jax.block_until_ready(out)

    ref = attention_reference(x, qkv_weight, q_bias, v_bias, proj_weight,
                              proj_bias, num_heads, head_dim)

    assert out.shape == (B, N, C)
    # Tolerance loosened slightly vs. exact f32: the softmax normalization uses
    # the EUP approx reciprocal (pl.reciprocal(..., approx=True)).
    assert jnp.allclose(out, ref, atol=2e-3, rtol=2e-3), \
        f"max abs diff {jnp.max(jnp.abs(out - ref))}"
    print("KERNEL_OK")
</pallas_src>

<mosaic_0001>
module attributes {stable_mosaic.version = 11 : i64} {
  func.func @attention_kernel(%arg0: i32, %arg1: i32, %arg2: memref<1x8x32xf32, #tpu.memory_space<vmem>>, %arg3: memref<1x32x96xf32, #tpu.memory_space<vmem>>, %arg4: memref<1x1x96xf32, #tpu.memory_space<vmem>>, %arg5: memref<1x32x32xf32, #tpu.memory_space<vmem>>, %arg6: memref<1x32xf32, #tpu.memory_space<vmem>>, %arg7: memref<1x8x32xf32, #tpu.memory_space<vmem>>, %arg8: memref<8x32xf32, #tpu.memory_space<vmem>>) attributes {dimension_semantics = [#tpu.dimension_semantics<parallel>, #tpu.dimension_semantics<arbitrary>], iteration_bounds = array<i64: 2, 1>, scalar_prefetch = 0 : i64, scratch_operands = 1 : i64, tpu.core_type = #tpu.core_type<tc>, window_params = [{transform_indices = @transform_0, window_bounds = array<i64: 1, 8, 32>}, {pipeline_mode = #tpu.pipeline_mode<synchronous>, transform_indices = @transform_1, window_bounds = array<i64: 1, 32, 96>}, {pipeline_mode = #tpu.pipeline_mode<synchronous>, transform_indices = @transform_2, window_bounds = array<i64: 1, 1, 96>}, {pipeline_mode = #tpu.pipeline_mode<synchronous>, transform_indices = @transform_3, window_bounds = array<i64: 1, 32, 32>}, {pipeline_mode = #tpu.pipeline_mode<synchronous>, transform_indices = @transform_4, window_bounds = array<i64: 1, 32>}, {transform_indices = @transform_5, window_bounds = array<i64: 1, 8, 32>}]} {
    %c0 = arith.constant 0 : index
    %c0_0 = arith.constant 0 : index
    %c0_1 = arith.constant 0 : index
    %0 = vector.load %arg2[%c0, %c0_0, %c0_1] : memref<1x8x32xf32, #tpu.memory_space<vmem>>, vector<1x8x32xf32>
    %1 = vector.shape_cast %0 : vector<1x8x32xf32> to vector<8x32xf32>
    %2 = arith.index_cast %arg1 : i32 to index
    %c0_2 = arith.constant 0 : index
    %c0_3 = arith.constant 0 : index
    %3 = vector.load %arg3[%2, %c0_2, %c0_3] : memref<1x32x96xf32, #tpu.memory_space<vmem>>, vector<1x32x96xf32>
    %4 = vector.shape_cast %3 : vector<1x32x96xf32> to vector<32x96xf32>
    %cst = arith.constant dense<0.000000e+00> : vector<8x96xf32>
    %5 = tpu.matmul %1, %4, %cst {dimension_numbers = #tpu.dot_dimension_numbers<[1], [0], [0], [1], [0, 0, 1, 1], [], []>} : vector<8x32xf32>, vector<32x96xf32>, vector<8x96xf32> -> vector<8x96xf32>
    %6 = arith.index_cast %arg1 : i32 to index
    %c0_4 = arith.constant 0 : index
    %c0_5 = arith.constant 0 : index
    %7 = vector.load %arg4[%6, %c0_4, %c0_5] : memref<1x1x96xf32, #tpu.memory_space<vmem>>, vector<1x1x96xf32>
    %8 = vector.shape_cast %7 : vector<1x1x96xf32> to vector<1x96xf32>
    %9 = vector.broadcast %8 : vector<1x96xf32> to vector<8x96xf32>
    %10 = arith.addf %5, %9 : vector<8x96xf32>
    %11 = vector.extract_strided_slice %10 {offsets = [0, 0], sizes = [8, 8], strides = [1, 1]} : vector<8x96xf32> to vector<8x8xf32>
    %12 = vector.extract_strided_slice %10 {offsets = [0, 32], sizes = [8, 8], strides = [1, 1]} : vector<8x96xf32> to vector<8x8xf32>
    %13 = vector.extract_strided_slice %10 {offsets = [0, 64], sizes = [8, 8], strides = [1, 1]} : vector<8x96xf32> to vector<8x8xf32>
    %cst_6 = arith.constant dense<0.000000e+00> : vector<8x8xf32>
    %14 = tpu.matmul %11, %12, %cst_6 {dimension_numbers = #tpu.dot_dimension_numbers<[1], [1], [0], [0], [0, 0, 1, 0], [], []>} : vector<8x8xf32>, vector<8x8xf32>, vector<8x8xf32> -> vector<8x8xf32>
    %cst_7 = arith.constant dense<0xFF800000> : vector<8xf32>
    %15 = vector.multi_reduction <maximumf>, %14, %cst_7 [1] : vector<8x8xf32> to vector<8xf32>
    %16 = vector.shape_cast %15 : vector<8xf32> to vector<8x1xf32>
    %17 = vector.broadcast %16 : vector<8x1xf32> to vector<8x8xf32>
    %18 = arith.subf %14, %17 : vector<8x8xf32>
    %19 = math.exp %18 : vector<8x8xf32>
    %cst_8 = arith.constant dense<0.000000e+00> : vector<8xf32>
    %20 = vector.multi_reduction <add>, %19, %cst_8 [1] : vector<8x8xf32> to vector<8xf32>
    %21 = vector.shape_cast %20 : vector<8xf32> to vector<8x1xf32>
    %22 = tpu.reciprocal %21 {approx = true} : vector<8x1xf32> -> vector<8x1xf32>
    %23 = vector.broadcast %22 : vector<8x1xf32> to vector<8x8xf32>
    %24 = arith.mulf %19, %23 : vector<8x8xf32>
    %cst_9 = arith.constant dense<0.000000e+00> : vector<8x8xf32>
    %25 = tpu.matmul %24, %13, %cst_9 {dimension_numbers = #tpu.dot_dimension_numbers<[1], [0], [0], [1], [0, 0, 1, 1], [], []>} : vector<8x8xf32>, vector<8x8xf32>, vector<8x8xf32> -> vector<8x8xf32>
    %26 = vector.extract_strided_slice %10 {offsets = [0, 8], sizes = [8, 8], strides = [1, 1]} : vector<8x96xf32> to vector<8x8xf32>
    %27 = vector.extract_strided_slice %10 {offsets = [0, 40], sizes = [8, 8], strides = [1, 1]} : vector<8x96xf32> to vector<8x8xf32>
    %28 = vector.extract_strided_slice %10 {offsets = [0, 72], sizes = [8, 8], strides = [1, 1]} : vector<8x96xf32> to vector<8x8xf32>
    %cst_10 = arith.constant dense<0.000000e+00> : vector<8x8xf32>
    %29 = tpu.matmul %26, %27, %cst_10 {dimension_numbers = #tpu.dot_dimension_numbers<[1], [1], [0], [0], [0, 0, 1, 0], [], []>} : vector<8x8xf32>, vector<8x8xf32>, vector<8x8xf32> -> vector<8x8xf32>
    %cst_11 = arith.constant dense<0xFF800000> : vector<8xf32>
    %30 = vector.multi_reduction <maximumf>, %29, %cst_11 [1] : vector<8x8xf32> to vector<8xf32>
    %31 = vector.shape_cast %30 : vector<8xf32> to vector<8x1xf32>
    %32 = vector.broadcast %31 : vector<8x1xf32> to vector<8x8xf32>
    %33 = arith.subf %29, %32 : vector<8x8xf32>
    %34 = math.exp %33 : vector<8x8xf32>
    %cst_12 = arith.constant dense<0.000000e+00> : vector<8xf32>
    %35 = vector.multi_reduction <add>, %34, %cst_12 [1] : vector<8x8xf32> to vector<8xf32>
    %36 = vector.shape_cast %35 : vector<8xf32> to vector<8x1xf32>
    %37 = tpu.reciprocal %36 {approx = true} : vector<8x1xf32> -> vector<8x1xf32>
    %38 = vector.broadcast %37 : vector<8x1xf32> to vector<8x8xf32>
    %39 = arith.mulf %34, %38 : vector<8x8xf32>
    %cst_13 = arith.constant dense<0.000000e+00> : vector<8x8xf32>
    %40 = tpu.matmul %39, %28, %cst_13 {dimension_numbers = #tpu.dot_dimension_numbers<[1], [0], [0], [1], [0, 0, 1, 1], [], []>} : vector<8x8xf32>, vector<8x8xf32>, vector<8x8xf32> -> vector<8x8xf32>
    %41 = vector.extract_strided_slice %10 {offsets = [0, 16], sizes = [8, 8], strides = [1, 1]} : vector<8x96xf32> to vector<8x8xf32>
    %42 = vector.extract_strided_slice %10 {offsets = [0, 48], sizes = [8, 8], strides = [1, 1]} : vector<8x96xf32> to vector<8x8xf32>
    %43 = vector.extract_strided_slice %10 {offsets = [0, 80], sizes = [8, 8], strides = [1, 1]} : vector<8x96xf32> to vector<8x8xf32>
    %cst_14 = arith.constant dense<0.000000e+00> : vector<8x8xf32>
    %44 = tpu.matmul %41, %42, %cst_14 {dimension_numbers = #tpu.dot_dimension_numbers<[1], [1], [0], [0], [0, 0, 1, 0], [], []>} : vector<8x8xf32>, vector<8x8xf32>, vector<8x8xf32> -> vector<8x8xf32>
    %cst_15 = arith.constant dense<0xFF800000> : vector<8xf32>
    %45 = vector.multi_reduction <maximumf>, %44, %cst_15 [1] : vector<8x8xf32> to vector<8xf32>
    %46 = vector.shape_cast %45 : vector<8xf32> to vector<8x1xf32>
    %47 = vector.broadcast %46 : vector<8x1xf32> to vector<8x8xf32>
    %48 = arith.subf %44, %47 : vector<8x8xf32>
    %49 = math.exp %48 : vector<8x8xf32>
    %cst_16 = arith.constant dense<0.000000e+00> : vector<8xf32>
    %50 = vector.multi_reduction <add>, %49, %cst_16 [1] : vector<8x8xf32> to vector<8xf32>
    %51 = vector.shape_cast %50 : vector<8xf32> to vector<8x1xf32>
    %52 = tpu.reciprocal %51 {approx = true} : vector<8x1xf32> -> vector<8x1xf32>
    %53 = vector.broadcast %52 : vector<8x1xf32> to vector<8x8xf32>
    %54 = arith.mulf %49, %53 : vector<8x8xf32>
    %cst_17 = arith.constant dense<0.000000e+00> : vector<8x8xf32>
    %55 = tpu.matmul %54, %43, %cst_17 {dimension_numbers = #tpu.dot_dimension_numbers<[1], [0], [0], [1], [0, 0, 1, 1], [], []>} : vector<8x8xf32>, vector<8x8xf32>, vector<8x8xf32> -> vector<8x8xf32>
    %56 = vector.extract_strided_slice %10 {offsets = [0, 24], sizes = [8, 8], strides = [1, 1]} : vector<8x96xf32> to vector<8x8xf32>
    %57 = vector.extract_strided_slice %10 {offsets = [0, 56], sizes = [8, 8], strides = [1, 1]} : vector<8x96xf32> to vector<8x8xf32>
    %58 = vector.extract_strided_slice %10 {offsets = [0, 88], sizes = [8, 8], strides = [1, 1]} : vector<8x96xf32> to vector<8x8xf32>
    %cst_18 = arith.constant dense<0.000000e+00> : vector<8x8xf32>
    %59 = tpu.matmul %56, %57, %cst_18 {dimension_numbers = #tpu.dot_dimension_numbers<[1], [1], [0], [0], [0, 0, 1, 0], [], []>} : vector<8x8xf32>, vector<8x8xf32>, vector<8x8xf32> -> vector<8x8xf32>
    %cst_19 = arith.constant dense<0xFF800000> : vector<8xf32>
    %60 = vector.multi_reduction <maximumf>, %59, %cst_19 [1] : vector<8x8xf32> to vector<8xf32>
    %61 = vector.shape_cast %60 : vector<8xf32> to vector<8x1xf32>
    %62 = vector.broadcast %61 : vector<8x1xf32> to vector<8x8xf32>
    %63 = arith.subf %59, %62 : vector<8x8xf32>
    %64 = math.exp %63 : vector<8x8xf32>
    %cst_20 = arith.constant dense<0.000000e+00> : vector<8xf32>
    %65 = vector.multi_reduction <add>, %64, %cst_20 [1] : vector<8x8xf32> to vector<8xf32>
    %66 = vector.shape_cast %65 : vector<8xf32> to vector<8x1xf32>
    %67 = tpu.reciprocal %66 {approx = true} : vector<8x1xf32> -> vector<8x1xf32>
    %68 = vector.broadcast %67 : vector<8x1xf32> to vector<8x8xf32>
    %69 = arith.mulf %64, %68 : vector<8x8xf32>
    %cst_21 = arith.constant dense<0.000000e+00> : vector<8x8xf32>
    %70 = tpu.matmul %69, %58, %cst_21 {dimension_numbers = #tpu.dot_dimension_numbers<[1], [0], [0], [1], [0, 0, 1, 1], [], []>} : vector<8x8xf32>, vector<8x8xf32>, vector<8x8xf32> -> vector<8x8xf32>
    %71 = tpu.concatenate %25, %40, %55, %70 in 1 : vector<8x8xf32>, vector<8x8xf32>, vector<8x8xf32>, vector<8x8xf32> -> vector<8x32xf32>
    %72 = arith.index_cast %arg1 : i32 to index
    %c0_22 = arith.constant 0 : index
    %c0_23 = arith.constant 0 : index
    %73 = vector.load %arg5[%72, %c0_22, %c0_23] : memref<1x32x32xf32, #tpu.memory_space<vmem>>, vector<1x32x32xf32>
    %74 = vector.shape_cast %73 : vector<1x32x32xf32> to vector<32x32xf32>
    %cst_24 = arith.constant dense<0.000000e+00> : vector<8x32xf32>
    %75 = tpu.matmul %71, %74, %cst_24 {dimension_numbers = #tpu.dot_dimension_numbers<[1], [0], [0], [1], [0, 0, 1, 1], [], []>} : vector<8x32xf32>, vector<32x32xf32>, vector<8x32xf32> -> vector<8x32xf32>
    %c0_i32 = arith.constant 0 : i32
    %76 = arith.cmpi eq, %arg1, %c0_i32 : i32
    %77 = arith.extui %76 : i1 to i32
    %c0_i32_25 = arith.constant 0 : i32
    %78 = arith.cmpi ne, %77, %c0_i32_25 : i32
    scf.if %78 {
      %c0_30 = arith.constant 0 : index
      %c0_31 = arith.constant 0 : index
      %85 = vector.load %arg6[%c0_30, %c0_31] : memref<1x32xf32, #tpu.memory_space<vmem>>, vector<1x32xf32>
      %86 = vector.broadcast %85 : vector<1x32xf32> to vector<8x32xf32>
      %87 = arith.addf %75, %86 : vector<8x32xf32>
      %c0_32 = arith.constant 0 : index
      %c0_33 = arith.constant 0 : index
      %88 = vector.load %arg8[%c0_32, %c0_33] : memref<8x32xf32, #tpu.memory_space<vmem>>, vector<8x32xf32>
      tpu.vector_store %arg8[%c0_32, %c0_33], %87 {strides = array<i32>} : memref<8x32xf32, #tpu.memory_space<vmem>>, vector<8x32xf32>,
    } else {
    }
    %c0_i32_26 = arith.constant 0 : i32
    %79 = arith.cmpi sgt, %arg1, %c0_i32_26 : i32
    %80 = arith.extui %79 : i1 to i32
    %c0_i32_27 = arith.constant 0 : i32
    %81 = arith.cmpi ne, %80, %c0_i32_27 : i32
    scf.if %81 {
      %c0_30 = arith.constant 0 : index
      %c0_31 = arith.constant 0 : index
      %85 = vector.load %arg8[%c0_30, %c0_31] : memref<8x32xf32, #tpu.memory_space<vmem>>, vector<8x32xf32>
      %86 = arith.addf %85, %75 : vector<8x32xf32>
      %c0_32 = arith.constant 0 : index
      %c0_33 = arith.constant 0 : index
      %87 = vector.load %arg8[%c0_32, %c0_33] : memref<8x32xf32, #tpu.memory_space<vmem>>, vector<8x32xf32>
      tpu.vector_store %arg8[%c0_32, %c0_33], %86 {strides = array<i32>} : memref<8x32xf32, #tpu.memory_space<vmem>>, vector<8x32xf32>,
    } else {
    }
    %c0_i32_28 = arith.constant 0 : i32
    %82 = arith.cmpi eq, %arg1, %c0_i32_28 : i32
    %83 = arith.extui %82 : i1 to i32
    %c0_i32_29 = arith.constant 0 : i32
    %84 = arith.cmpi ne, %83, %c0_i32_29 : i32
    scf.if %84 {
      %c0_30 = arith.constant 0 : index
      %c0_31 = arith.constant 0 : index
      %85 = vector.load %arg8[%c0_30, %c0_31] : memref<8x32xf32, #tpu.memory_space<vmem>>, vector<8x32xf32>
      %c0_32 = arith.constant 0 : index
      %c0_33 = arith.constant 0 : index
      %c0_34 = arith.constant 0 : index
      %86 = vector.load %arg7[%c0_32, %c0_33, %c0_34] : memref<1x8x32xf32, #tpu.memory_space<vmem>>, vector<1x8x32xf32>
      %87 = vector.shape_cast %86 : vector<1x8x32xf32> to vector<8x32xf32>
      %88 = vector.shape_cast %85 : vector<8x32xf32> to vector<1x8x32xf32>
      tpu.vector_store %arg7[%c0_32, %c0_33, %c0_34], %88 {strides = array<i32>} : memref<1x8x32xf32, #tpu.memory_space<vmem>>, vector<1x8x32xf32>,
    } else {
    }
    return
  }
  func.func @transform_0(%arg0: i32, %arg1: i32) -> (i32, i32, i32) {
    %c0_i32 = arith.constant 0 : i32
    %c0_i32_0 = arith.constant 0 : i32
    %c0_i32_1 = arith.constant 0 : i32
    return %arg0, %c0_i32, %c0_i32_0 : i32, i32, i32
  }
  func.func @transform_1(%arg0: i32, %arg1: i32) -> (i32, i32, i32) {
    %c0_i32 = arith.constant 0 : i32
    %c0_i32_0 = arith.constant 0 : i32
    %c0_i32_1 = arith.constant 0 : i32
    %c0_i32_2 = arith.constant 0 : i32
    return %c0_i32, %c0_i32_0, %c0_i32_1 : i32, i32, i32
  }
  func.func @transform_2(%arg0: i32, %arg1: i32) -> (i32, i32, i32) {
    %c0_i32 = arith.constant 0 : i32
    %c0_i32_0 = arith.constant 0 : i32
    %c0_i32_1 = arith.constant 0 : i32
    %c0_i32_2 = arith.constant 0 : i32
    return %c0_i32, %c0_i32_0, %c0_i32_1 : i32, i32, i32
  }
  func.func @transform_3(%arg0: i32, %arg1: i32) -> (i32, i32, i32) {
    %c0_i32 = arith.constant 0 : i32
    %c0_i32_0 = arith.constant 0 : i32
    %c0_i32_1 = arith.constant 0 : i32
    %c0_i32_2 = arith.constant 0 : i32
    return %c0_i32, %c0_i32_0, %c0_i32_1 : i32, i32, i32
  }
  func.func @transform_4(%arg0: i32, %arg1: i32) -> (i32, i32) {
    %c0_i32 = arith.constant 0 : i32
    %c0_i32_0 = arith.constant 0 : i32
    %c0_i32_1 = arith.constant 0 : i32
    return %c0_i32, %c0_i32_0 : i32, i32
  }
  func.func @transform_5(%arg0: i32, %arg1: i32) -> (i32, i32, i32) {
    %c0_i32 = arith.constant 0 : i32
    %c0_i32_0 = arith.constant 0 : i32
    %c0_i32_1 = arith.constant 0 : i32
    return %arg0, %c0_i32, %c0_i32_0 : i32, i32, i32
  }
}

</mosaic_0001>

<bundles_post_ra>
// kernel: tpu_custom_call.1
= control target key start
LH: loop header
LB: loop body
LE: loop exit
PB: predicated region body
PF: predicated region fallthrough
CT: control target
= control target key end

     0   :  { %10 = vsyncpa [#allocation4], 0  ;;  %s2078_s0 = inlined_call_operand.hbm [shape: f32[2,8,32], index: 0, kind: input, shape index: {}]   ;;  %s2079_s1 = inlined_call_operand.hbm [shape: f32[1,32,96], index: 1, kind: input, shape index: {}]   ;;  %s2080_s2 = inlined_call_operand.vmem [shape: f32[1,1,96], index: 2, kind: input, shape index: {}]   ;;  %s2081_s3 = inlined_call_operand.hbm [shape: f32[1,32,32], index: 3, kind: input, shape index: {}]   ;;  %s2082_s4 = inlined_call_operand.vmem [shape: f32[1,32], index: 4, kind: input, shape index: {}]   ;;  %s2083_s5 = inlined_call_operand.hbm [shape: f32[2,8,32], index: 5, kind: output, shape index: {}]  }
   0x1   :  { %12 = vsyncpa [#allocation4 + $0x1], 0 }
   0x2   :  { %13 = vsyncpa [#allocation7], 0 }
   0x3   :  { %14 = vsyncpa [#allocation5], 0 }
   0x4   :  { %16 = vsyncpa [#allocation5 + $0x1], 0  ;;  %s1744_s18 = smov 0   ;;  %s1746_s19 = smov 0  }
   0x5   :  { %s1748_s20 = smov 0   ;;  %s1750_s21 = smov 0  }
   0x6   :  { %s1752_s22 = smov 0   ;;  %s1754_s23 = smov 0  }
   0x7 LB: > { %s1266_s24 = sadd.s32 4294967295, %s1689_s23   ;;  %s1267_s25 = sadd.s32 4294967294, %s1689_s23   ;;  %s1689_s23 = sphi %s1754_s23, %s22_s23   ;;  %s1685_s22 = sphi %s1752_s22, %s2105_s22   ;;  %s1681_s21 = sphi %s1750_s21, %s2104_s21   ;;  %s1677_s20 = sphi %s1748_s20, %s2103_s20   ;;  %s1673_s19 = sphi %s1746_s19, %s2102_s19   ;;  %s1669_s18 = sphi %s1744_s18, %s2101_s18  }
   0x8   : > { %p54_p0 = scmp.ne.s32.totalorder %s1673_s19, %s1669_s18  ;;  %p1778_p1 = scmp.eq.s32.totalorder %s1266_s24, 0 }
   0x9   : > { %p1782_p2 = scmp.eq.s32.totalorder %s1266_s24, 1  ;;  %p168_p3 = scmp.eq.s32.totalorder %s1267_s25, 1 }
   0xa   : > { %s2088_s26 = scalar_select %p1778_p1, 1, 0 }
   0xb   : > { %p1788_p4 = por %p1778_p1, %p54_p0  ;;  %p1268_p5 = scmp.ge.s32.totalorder %s1689_s23, 1 }
   0xc   : > { %p1793_p6 = por %p168_p3, %p54_p0  ;;  %p175_p7 = scmp.lt.s32.totalorder %s1689_s23, 3 }
   0xd   : > { %s2090_s28 = scalar_select %p1788_p4, 1, 0 }
   0xe   : > { %s2091_s29 = scalar_select %p1793_p6, 1, 0 }
   0xf   : > { %p1798_p8 = pnand %p1268_p5, %p175_p7  ;;  %s1691_s6 = smov [#allocation6]  }
  0x10   : > { %s187_s7 = sshll.u32 %s1691_s6, 4  ;;  %s1692_s9 = smov [#allocation8]   ;;  %s1802_s7 = int_to_ptr.vmem [resolvable:$true] %s187_s7 }
  0x11   : > { %p1411_p9 = pneg %p1798_p8  ;;  %s203_s10 = sshll.u32 %s1692_s9, 4  ;;  %s1813_s10 = int_to_ptr.vmem [resolvable:$true] %s203_s10 }
  0x12   : > { %s1517_s13 = scalar_lea.hbm %s2079_s1, 512 }
  0x13   : > { %p1809_p11 = pnand %p1411_p9, %p1778_p1  ;;  %p1518_p12 = scmp.ne.s32.totalorder %s2079_s1, %s1517_s13 }
  0x14   : > { %p1524_p5 = scmp.lt.u32.totalorder %s1517_s13, %s2079_s1 }
  0x15   : > { %p1519_p13 = pneg %p1809_p11 }
  0x17   : > { %p1520_p0 = pnand %p1519_p13, %p1518_p12 }
  0x19   : > { %p1521_p3 = pneg %p1520_p0 }
  0x1b   : > { %p1526_p7 = pnand %p1524_p5, %p1521_p3 }
  0x1d   : > { %1529 = shalt.err (!%p1526_p7)
}
  0x1e   : > { %s1530_s24 = scalar_lea.vmem %s1802_s7, 512  ;;  %p1538_p1 = scmp.lt.s32.totalorder %s1802_s7, %s1802_s7 }
  0x1f   : > { %p1531_p9 = scmp.ne.s32.totalorder %s1802_s7, %s1530_s24  ;;  %p1539_p12 = scmp.lt.s32.totalorder %s1530_s24, %s1530_s24 }
  0x21   : > { %p1533_p10 = pnand %p1531_p9, %p1519_p13  ;;  %p1540_p0 = por %p1539_p12, %p1538_p1 }
  0x23   : > { %p1534_p6 = pneg %p1533_p10 }
  0x25   : > { %p1541_p4 = pnand %p1540_p0, %p1534_p6 }
  0x27   : > { %1544 = shalt.err (!%p1541_p4)
}
  0x28   : > { %s1693_s25 = smov 128   ;;  %s1694_s6 = smov 8  }
  0x29   : > { %1414 = dma.hbm_to_vmem [thread:$0]  (!%p1809_p11), %s2079_s1, 512, %s1802_s7, [#allocation7], %s1693_s25, %s1693_s25, %s1694_s6  }
  0x2a   : > { %s1545_s14 = scalar_lea.hbm %s2081_s3, 512 }
  0x2b   : > { %p1546_p1 = scmp.ne.s32.totalorder %s2081_s3, %s1545_s14  ;;  %p1552_p10 = scmp.lt.u32.totalorder %s1545_s14, %s2081_s3 }
  0x2d   : > { %p1548_p4 = pnand %p1546_p1, %p1519_p13 }
  0x2f   : > { %p1549_p6 = pneg %p1548_p4 }
  0x31   : > { %p1554_p3 = pnand %p1552_p10, %p1549_p6 }
  0x33   : > { %1557 = shalt.err (!%p1554_p3)
}
  0x34   : > { %s1558_s7 = scalar_lea.vmem %s1813_s10, 512  ;;  %p1566_p12 = scmp.lt.s32.totalorder %s1813_s10, %s1813_s10 }
  0x35   : > { %p1559_p5 = scmp.ne.s32.totalorder %s1813_s10, %s1558_s7  ;;  %p1567_p0 = scmp.lt.s32.totalorder %s1558_s7, %s1558_s7 }
  0x37   : > { %p1561_p7 = pnand %p1559_p5, %p1519_p13  ;;  %p1568_p1 = por %p1567_p0, %p1566_p12 }
  0x39   : > { %p1562_p9 = pneg %p1561_p7 }
  0x3b   : > { %p1569_p4 = pnand %p1568_p1, %p1562_p9 }
  0x3d   : > { %1572 = shalt.err (!%p1569_p4)
}
  0x3e   : > { %1417 = dma.hbm_to_vmem [thread:$0]  (!%p1809_p11), %s2081_s3, 512, %s1813_s10, [#allocation7], %s1693_s25, %s1693_s25, %s1694_s6  }
  0x3f   : > { %s34_s12 = sadd.s32 1, %s1685_s22  ;;  %s41_s13 = sadd.s32 1, %s1677_s20 }
  0x40   : > { %p36_p13 = scmp.ge.s32.totalorder %s34_s12, 2  ;;  %p48_p6 = scmp.ne.s32.totalorder %s1677_s20, %s1673_s19 }
  0x41   : > { %p49_p10 = scmp.eq.s32.totalorder %s1689_s23, 0  ;;  %p1428_p3 = scmp.lt.s32.totalorder %s1689_s23, 2 }
  0x42   : > { %s2107_s12 = smov (%p36_p13, %s34_s12), 0  ;;  %p1877_p7 = por %p1782_p2, %p48_p6 }
  0x43   : > { %p50_p5 = por %p49_p10, %p48_p6  ;;  %s38_s14 = ssub.s32 %s1685_s22, %s2107_s12 }
  0x44   : > { %s2094_s8 = scalar_select %p1877_p7, 1, 0 }
  0x45   : > { %s220_s15 = sand.u32 1, %s1677_s20   ;;  %p39_p9 = scmp.eq.s32.totalorder %s38_s14, 0 }
  0x46   : > { %s1272_s10 = sshll.u32 %s220_s15, 3  ;;  %s1273_s25 = sshll.u32 %s1685_s22, 7 }
  0x47   : > { %s1886_s6 = scalar_select %p39_p9, %s1677_s20, %s41_s13  }
  0x48   : > { %s1891_s24 = scalar_lea.hbm %s2078_s0, %s1273_s25  ;;  %s224_s27 = scalar_lea.vmem [#allocation3], %s1272_s10 }
  0x49   : > { %s231_s7 = sshll.u32 %s224_s27, 4  ;;  %p1895_p2 = pnand %p1428_p3, %p50_p5  ;;  %s1899_s7 = int_to_ptr.vmem [resolvable:$true] %s231_s7 }
  0x4a   : > { %s221_s11 = scalar_lea.sflag [#allocation4], %s220_s15  ;;  %s1573_s13 = scalar_lea.hbm %s1891_s24, 128 }
  0x4b   : > { %p1574_p11 = scmp.ne.s32.totalorder %s1891_s24, %s1573_s13  ;;  %p1575_p12 = pneg %p1895_p2 }
  0x4c   : > { %s1578_s25 = scalar_lea.hbm %s2078_s0, 256  ;;  %p1579_p4 = scmp.lt.u32.totalorder %s1891_s24, %s2078_s0 }
  0x4d   : > { %p1576_p0 = pnand %p1575_p12, %p1574_p11  ;;  %p1580_p13 = scmp.lt.u32.totalorder %s1578_s25, %s1573_s13 }
  0x4e   : > { %p1582_p10 = scmp.lt.u32.totalorder %s1573_s13, %s1891_s24 }
  0x4f   : > { %p1577_p1 = pneg %p1576_p0  ;;  %p1581_p6 = por %p1580_p13, %p1579_p4 }
  0x51   : > { %p1583_p3 = por %p1582_p10, %p1581_p6 }
  0x53   : > { %p1584_p5 = pnand %p1583_p3, %p1577_p1 }
  0x55   : > { %1587 = shalt.err (!%p1584_p5)
}
  0x56   : > { %s1588_s15 = scalar_lea.vmem %s1899_s7, 128  ;;  %s1695_s27 = smov [#allocation3]  }
  0x57   : > { %p1589_p9 = scmp.ne.s32.totalorder %s1899_s7, %s1588_s15  ;;  %s1593_s14 = sshll.u32 %s1695_s27, 4  ;;  %s1594_s14 = int_to_ptr.vmem [resolvable:$false] %s1593_s14 }
  0x58   : > { %s1595_s10 = scalar_lea.vmem %s1594_s14, 256  ;;  %p1596_p7 = scmp.lt.s32.totalorder %s1899_s7, %s1594_s14 }
  0x59   : > { %p1591_p11 = pnand %p1589_p9, %p1575_p12  ;;  %p1597_p4 = scmp.lt.s32.totalorder %s1595_s10, %s1588_s15 }
  0x5b   : > { %p1592_p0 = pneg %p1591_p11  ;;  %p1598_p13 = por %p1597_p4, %p1596_p7 }
  0x5d   : > { %p1599_p6 = pnand %p1598_p13, %p1592_p0 }
  0x5f   : > { %1602 = shalt.err (!%p1599_p6)
}
  0x60   : > { %1421 = dma.hbm_to_vmem [thread:$0]  (!%p1895_p2), %s1891_s24, 128, %s1899_s7, %s221_s11  }
  0x61   : > { %240 = sbr.rel (%p1798_p8) target bundleno = 2119 (0x847), region = 40  ;;  %s1929_s13 = sand.u32 (!%p1798_p8), 1, %s1673_s19  }
  0x62   : > { %s1275_s25 = sshll.u32 (!%p1798_p8), %s1929_s13, 3  ;;  %s243_s16 = scalar_lea.sflag (!%p1798_p8), [#allocation4], %s1929_s13 }
  0x63   : > { %s246_s17 = scalar_lea.vmem (!%p1798_p8), [#allocation3], %s1275_s25  ;;  %p2096_p7 = scmp.ne.s32.totalorder (!%p1798_p8), %s2090_s28, 0 }
  0x68   : > { %1656 = dma.done.wait (%p2096_p7), %s243_s16, 128  }
  0x69   : > { %1658 = vsyncadd (%p2096_p7), %s243_s16, 4294967168  ;;  %p2097_p2 = scmp.ne.s32.totalorder %s2088_s26, 0 }
  0x6b   : > { %1660 = dma.done.wait (%p2097_p2), [#allocation7], 1024  }
  0x6c   : > { %1662 = vsyncadd (%p2097_p2), [#allocation7], 4294966272  ;;  %v1696_v0 = vmov 0.0|0.0   ;;  %vm1697_vm0 = vmmov 0   ;;  %v1698_v1 = vmov 0.0   ;;  %v284_v2 = vld [vmem:[#allocation6] sm:$0xff] }
  0x6d   : > { %1387 = vmatprep.subr.bf16.mxu0 %v1696_v0  ;;  %1333 = vmatprep.mubr.msk.f32.mxu0 %vm1697_vm0, %v1698_v1  ;;  %v285_v3 = vld [vmem:[#allocation6 + $0x8] sm:$0xff]  ;;  %v286_v4 = vld [vmem:[#allocation6 + $0x10] sm:$0xff]  ;;  %v287_v6 = vld [vmem:[#allocation6 + $0x18] sm:$0xff]  ;;  %vm296_vm1 = vcmask 261120   ;;  %s1699_s30 = smov 64   ;;  %s1700_s24 = smov 96  }
  0x6e   : > { %1336 = vmatprep.subr.mxu1 %v1698_v1  ;;  %1338 = vmatprep.mubr.msk.f32.mxu1 %vm1697_vm0, %v1698_v1  ;;  %v1388_v5 = vpack.c.bf16 %v285_v3, %v284_v2  ;;  %v1391_v7 = vpack.c.bf16 %v287_v6, %v286_v4  ;;  %v281_v8 = vld [vmem:[%s246_s17] sm:$0xff]  ;;  %v1279_v9 = vld [vmem:[%s2080_s2] ss:$0 sm:$0xff]  ;;  %s1701_s7 = smov 88   ;;  %s1702_s9 = smov 120   ;;  %vm373_vm2 = vcmask 64512  }
  0x6f   : > { %s1703_s11 = smov 80   ;;  %s1704_s15 = smov 72   ;;  %vm1043_vm3 = vcmask 130048   ;;  %vm1045_vm4 = vcmask 195584  }
  0x70   : > { %1389 = vmatpush3.bf16.msra.mxu0 %v1388_v5  ;;  %s1705_s27 = smov 112   ;;  %s1706_s14 = smov 104  }
  0x71   : > { %1390 = vmatprep.subr.bf16.mxu0 %v1696_v0  ;;  %s1707_s10 = smov 56   ;;  %s1708_s16 = smov 48  }
  0x72   : > { %s1709_s17 = smov 40   ;;  %s1710_s26 = smov 8  }
  0x73   : > { %s1711_s28 = smov 16   ;;  %p2098_p12 = scmp.ne.s32.totalorder %s2094_s8, 0 }
  0x74   : > { %1392 = vmatpush3.bf16.msra.mxu0 %v1391_v7 }
  0x75   : > { %1356 = vmatprep.subr.mxu0 %v1698_v1 }
  0x77   : > { %1334 = vmatmul.mubr.msk.f32.vlgmr.msra.gmra.mrb[0].mxu0 %vm296_vm1, %v281_v8  ;;  %v1048_v8 = vld [vmem:[#allocation8] sm:$0xff] }
  0x78   : > { %1358 = vmatprep.mubr.msk.f32.mxu0 %vm1697_vm0, %v1698_v1 }
 0x14a   : > { %v366_v10 = vpop.f32.mrb[0].mxu0 }
 0x14b   : > { %v1957_v11 = vadd.f32 %v1279_v9, %v366_v10  ;;  %v1335_v12 = vpop.f32.mrb[1].mxu0  ;;  %v1049_v9 = vld [vmem:[#allocation8 + $0x8] sm:$0xff] }
 0x14c   : > { %v1394_v10 = vpack.c.bf16 %v1049_v9, %v1048_v8  ;;  %v1051_v12 = vld [vmem:[#allocation8 + $0x18] sm:$0xff] }
 0x14d   : > { %459 = vrot.lane.b32.xlu1 %v1957_v11, %s1699_s30  ;;  %371 = vrot.lane.b32.xlu0 %v1957_v11, %s1700_s24  ;;  %s1712_s30 = smov 24  }
 0x151   : > { %537 = vrot.lane.b32.xlu1 %v1957_v11, %s1701_s7 }
 0x155   : > { %535 = vrot.lane.b32.xlu1 %v1957_v11, %s1702_s9  ;;  %s1296_s9 = sshll.u32 %s1681_s21, 7  ;;  %s1713_s21 = smov [#allocation9]  }
 0x159   : > { %702 = vrot.lane.b32.xlu1 %v1957_v11, %s1703_s11  ;;  %s280_s11 = scalar_lea.vmem [#allocation9], %s1275_s25  ;;  %s1607_s25 = sshll.u32 %s1713_s21, 4  ;;  %s1608_s25 = int_to_ptr.vmem [resolvable:$false] %s1607_s25 }
 0x1bf   : > { %v460_v13 = vpop.permute.xlu1 %459  ;;  %v372_v14 = vpop.permute.xlu0 %371 }
 0x1c0   : > { %1337 = vmatpush3.xpose.msk.msra.mxu1 %vm373_vm2, %v372_v14 }
 0x1c1   : > { %1341 = vmatprep.subr.mxu1 %v1698_v1 }
 0x1c3   : > { %v538_v15 = vpop.permute.xlu1 %537  ;;  %1339 = vmatmul.mubr.msk.f32.vlgmr.msra.gmra.mrb[0].mxu1 %vm373_vm2, %v1957_v11 }
 0x1c4   : > { %1342 = vmatpush3.msra.mxu1 %v460_v13  ;;  %1343 = vmatprep.mubr.msk.f32.mxu1 %vm1697_vm0, %v1698_v1 }
 0x1c5   : > { %1346 = vmatprep.subr.mxu1 %v1698_v1 }
 0x1c7   : > { %v536_v16 = vpop.permute.xlu1 %535 }
 0x1cb   : > { %v703_v17 = vpop.permute.xlu1 %702 }
 0x1cc   : > { %1357 = vmatpush3.xpose.msk.msra.mxu0 %vm373_vm2, %v703_v17 }
 0x1cd   : > { %1366 = vmatprep.subr.mxu0 %v1698_v1 }
 0x296   : > { %v444_v18 = vpop.f32.mrb[0].mxu1 }
 0x297   : > { %v1340_v19 = vpop.f32.mrb[1].mxu1  ;;  %v448_v20 = vsel %vm373_vm2, %v444_v18, -inf }
 0x298   : > { %449 = vmax.xlane.f32.xlu0 %v448_v20 }
 0x2ae   : > { %867 = vrot.lane.b32.xlu0 %v1957_v11, %s1704_s15  ;;  %s1164_s15 = sshll.u32 %s280_s11, 4  ;;  %s2030_s15 = int_to_ptr.vmem [resolvable:$true] %s1164_s15 }
 0x2af   : > { %p1610_p3 = scmp.lt.s32.totalorder %s2030_s15, %s1608_s25 }
 0x325   : > { %v450_v21 = vpop.xlane.xlu0 %449 }
 0x326   : > { %v451_v22 = vsub.f32 %v444_v18, %v450_v21 }
 0x328   : > { %v452_v23 = vmul.f32 1.442695, %v451_v22 }
 0x329   : > { %v868_v28 = vpop.permute.xlu0 %867 }
 0x32a   : > { %1501 = vpow2.f32 %v452_v23 }
 0x334   : > { %v1502_v24 = vpop.eup %1501 }
 0x335   : > { %v454_v25 = vsel %vm373_vm2, %v1502_v24, 0.0 }
 0x336   : > { %455 = vadd.xlane.f32.xlu1 %v454_v25 }
 0x347   : > { %700 = vrot.lane.b32.xlu1 %v1957_v11, %s1705_s27 }
 0x34b   : > { %865 = vrot.lane.b32.xlu1 %v1957_v11, %s1706_s14 }
 0x3c3   : > { %v456_v26 = vpop.xlane.xlu1 %455 }
 0x3c4   : > { %1503 = vrcp.f32 %v456_v26 }
 0x3c7   : > { %v701_v27 = vpop.permute.xlu1 %700 }
 0x3c8   : > { %1359 = vmatmul.mubr.msk.f32.vlgmr.msra.gmra.mrb[2].mxu0 %vm373_vm2, %v701_v27 }
 0x3c9   : > { %1367 = vmatpush3.xpose.msk.msra.mxu0 %vm373_vm2, %v868_v28  ;;  %1368 = vmatprep.mubr.msk.f32.mxu0 %vm1697_vm0, %v1698_v1 }
 0x3ca   : > { %1393 = vmatprep.subr.bf16.mxu0 %v1696_v0 }
 0x3cb   : > { %v866_v29 = vpop.permute.xlu1 %865 }
 0x3cc   : > { %1369 = vmatmul.mubr.msk.f32.vlgmr.msra.gmra.mrb[4].mxu0 %vm373_vm2, %v866_v29 }
 0x3cd   : > { %1384 = vmatprep.mubr.msk.f32.mxu0 %vm1697_vm0, %v1698_v1  ;;  %1395 = vmatpush3.bf16.msra.mxu0 %v1394_v10 }
 0x3ce   : > { %v1504_v30 = vpop.eup %1503  ;;  %1396 = vmatprep.subr.bf16.mxu0 %v1696_v0 }
 0x3cf   : > { %v458_v31 = vmul.f32 %v1504_v30, %v1502_v24  ;;  %v1294_v24 = vld [vmem:[%s2082_s4] ss:$0 sm:$0xff] }
 0x3d1   : > { %1344 = vmatmul.mubr.msk.f32.vlgmr.msra.gmra.mrb[2].mxu1 %vm373_vm2, %v458_v31 }
 0x3d2   : > { %1347 = vmatpush3.xpose.msk.msra.mxu1 %vm373_vm2, %v538_v15  ;;  %1348 = vmatprep.mubr.msk.f32.mxu1 %vm1697_vm0, %v1698_v1 }
 0x3d3   : > { %1351 = vmatprep.subr.mxu1 %v1698_v1 }
 0x3d5   : > { %1349 = vmatmul.mubr.msk.f32.vlgmr.msra.gmra.mrb[4].mxu1 %vm373_vm2, %v536_v16 }
 0x3d6   : > { %1353 = vmatprep.mubr.msk.f32.mxu1 %vm1697_vm0, %v1698_v1 }
 0x49b   : > { %v774_v32 = vpop.f32.mrb[2].mxu0 }
 0x49c   : > { %v1360_v33 = vpop.f32.mrb[3].mxu0  ;;  %v778_v34 = vsel %vm373_vm2, %v774_v32, -inf }
 0x49d   : > { %779 = vmax.xlane.f32.xlu0 %v778_v34 }
 0x49f   : > { %v939_v35 = vpop.f32.mrb[4].mxu0 }
 0x4a0   : > { %v1370_v36 = vpop.f32.mrb[5].mxu0  ;;  %v943_v42 = vsel %vm373_vm2, %v939_v35, -inf }
 0x4a4   : > { %v1995_v37 = vpop.f32.mrb[2].mxu1 }
 0x4a5   : > { %v1345_v38 = vpop.f32.mrb[3].mxu1 }
 0x4a8   : > { %v609_v39 = vpop.f32.mrb[4].mxu1 }
 0x4a9   : > { %v1350_v40 = vpop.f32.mrb[5].mxu1  ;;  %v613_v41 = vsel %vm373_vm2, %v609_v39, -inf }
 0x4aa   : > { %614 = vmax.xlane.f32.xlu1 %v613_v41 }
 0x4ae   : > { %944 = vmax.xlane.f32.xlu1 %v943_v42 }
 0x52a   : > { %v780_v43 = vpop.xlane.xlu0 %779 }
 0x52b   : > { %v781_v44 = vsub.f32 %v774_v32, %v780_v43 }
 0x52d   : > { %v782_v45 = vmul.f32 1.442695, %v781_v44 }
 0x52f   : > { %1505 = vpow2.f32 %v782_v45 }
 0x537   : > { %v615_v46 = vpop.xlane.xlu1 %614 }
 0x538   : > { %v616_v54 = vsub.f32 %v609_v39, %v615_v46 }
 0x539   : > { %v1506_v47 = vpop.eup %1505 }
 0x53a   : > { %v784_v48 = vsel %vm373_vm2, %v1506_v47, 0.0  ;;  %v617_v55 = vmul.f32 1.442695, %v616_v54 }
 0x53b   : > { %785 = vadd.xlane.f32.xlu1 %v784_v48  ;;  %v945_v49 = vpop.xlane.xlu1 %944 }
 0x53c   : > { %v946_v50 = vsub.f32 %v939_v35, %v945_v49 }
 0x53e   : > { %v947_v51 = vmul.f32 1.442695, %v946_v50 }
 0x540   : > { %1507 = vpow2.f32 %v947_v51 }
 0x541   : > { %1509 = vpow2.f32 %v617_v55 }
 0x54a   : > { %v1508_v52 = vpop.eup %1507 }
 0x54b   : > { %v949_v53 = vsel %vm373_vm2, %v1508_v52, 0.0  ;;  %v1510_v56 = vpop.eup %1509 }
 0x54c   : > { %624 = vrot.lane.b32.xlu1 %v1957_v11, %s1707_s10  ;;  %950 = vadd.xlane.f32.xlu0 %v949_v53  ;;  %v619_v57 = vsel %vm373_vm2, %v1510_v56, 0.0  ;;  %s2028_s10 = scalar_lea.hbm %s2083_s5, %s1296_s9 }
 0x562   : > { %789 = vrot.lane.b32.xlu0 %v1957_v11, %s1708_s16  ;;  %s1151_s16 = scalar_lea.sflag [#allocation5], %s1929_s13 }
 0x570   : > { %620 = vadd.xlane.f32.xlu1 %v619_v57 }
 0x581   : > { %954 = vrot.lane.b32.xlu1 %v1957_v11, %s1709_s17  ;;  %v1050_v11 = vld [vmem:[#allocation8 + $0x10] sm:$0xff]  ;;  %s1603_s17 = scalar_lea.vmem %s2030_s15, 128 }
 0x582   : > { %v1397_v13 = vpack.c.bf16 %v1051_v12, %v1050_v11  ;;  %p1604_p8 = scmp.ne.s32.totalorder %s2030_s15, %s1603_s17 }
 0x584   : > { %1398 = vmatpush3.bf16.msra.mxu0 %v1397_v13  ;;  %p1605_p1 = pnand %p1604_p8, %p2098_p12 }
 0x586   : > { %p1606_p10 = pneg %p1605_p1 }
 0x5c8   : > { %v786_v58 = vpop.xlane.xlu1 %785 }
 0x5cc   : > { %v625_v59 = vpop.permute.xlu1 %624 }
 0x5cd   : > { %1352 = vmatpush3.msra.mxu1 %v625_v59 }
 0x5ce   : > { %1361 = vmatprep.subr.mxu1 %v1698_v1 }
 0x5d9   : > { %v951_v61 = vpop.xlane.xlu0 %950 }
 0x5dd   : > { %v790_v3 = vpop.permute.xlu0 %789 }
 0x5fd   : > { %v621_v60 = vpop.xlane.xlu1 %620 }
 0x5fe   : > { %1511 = vrcp.f32 %v621_v60 }
 0x5ff   : > { %1513 = vrcp.f32 %v786_v58 }
 0x600   : > { %1515 = vrcp.f32 %v951_v61 }
 0x601   : > { %v955_v6 = vpop.permute.xlu1 %954 }
 0x608   : > { %v1512_v62 = vpop.eup %1511 }
 0x609   : > { %v623_v63 = vmul.f32 %v1512_v62, %v1510_v56  ;;  %v1514_v2 = vpop.eup %1513 }
 0x60a   : > { %v788_v4 = vmul.f32 %v1514_v2, %v1506_v47  ;;  %v1516_v5 = vpop.eup %1515 }
 0x60b   : > { %1354 = vmatmul.mubr.msk.f32.vlgmr.msra.gmra.mrb[6].mxu1 %vm373_vm2, %v623_v63  ;;  %v953_v7 = vmul.f32 %v1516_v5, %v1508_v52 }
 0x60c   : > { %1362 = vmatpush3.msra.mxu1 %v790_v3  ;;  %1363 = vmatprep.mubr.msk.f32.mxu1 %vm1697_vm0, %v1698_v1 }
 0x60d   : > { %1371 = vmatprep.subr.mxu1 %v1698_v1 }
 0x60f   : > { %1364 = vmatmul.mubr.msk.f32.vlgmr.msra.gmra.mrb[8].mxu1 %vm373_vm2, %v788_v4 }
 0x610   : > { %1372 = vmatpush3.msra.mxu1 %v955_v6  ;;  %1373 = vmatprep.mubr.msk.f32.mxu1 %vm1697_vm0, %v1698_v1 }
 0x613   : > { %1374 = vmatmul.mubr.msk.f32.vlgmr.msra.gmra.mrb[10].mxu1 %vm373_vm2, %v953_v7 }
 0x6de   : > { %v696_v14 = vpop.f32.mrb[6].mxu1 }
 0x6df   : > { %1031 = vrot.lane.b32.xlu1 %v696_v14, %s1710_s26  ;;  %v1355_v15 = vpop.f32.mrb[7].mxu1  ;;  %s1609_s26 = scalar_lea.vmem %s1608_s25, 256 }
 0x6e0   : > { %p1611_p5 = scmp.lt.s32.totalorder %s1609_s26, %s1603_s17 }
 0x6e2   : > { %v861_v16 = vpop.f32.mrb[8].mxu1  ;;  %p1612_p9 = por %p1611_p5, %p1610_p3 }
 0x6e3   : > { %1035 = vrot.lane.b32.xlu0 %v861_v16, %s1711_s28  ;;  %v1365_v1 = vpop.f32.mrb[9].mxu1 }
 0x6e4   : > { %p1613_p11 = pnand %p1612_p9, %p1606_p10 }
 0x6e6   : > { %v1026_v17 = vpop.f32.mrb[10].mxu1 }
 0x6e7   : > { %1039 = vrot.lane.b32.xlu1 %v1026_v17, %s1712_s30  ;;  %v1375_v18 = vpop.f32.mrb[11].mxu1 }
 0x751   : > { %v1032_v19 = vpop.permute.xlu1 %1031 }
 0x752   : > { %v1042_v20 = vsel %vm373_vm2, %v1995_v37, %v1032_v19 }
 0x755   : > { %v1036_v0 = vpop.permute.xlu0 %1035 }
 0x756   : > { %v1044_v21 = vsel %vm1043_vm3, %v1042_v20, %v1036_v0 }
 0x759   : > { %v1040_v22 = vpop.permute.xlu1 %1039 }
 0x75a   : > { %v1046_v23 = vsel %vm1045_vm4, %v1044_v21, %v1040_v22 }
 0x75b   : > { %1385 = vmatmul.mubr.msk.f32.vlgmr.msra.gmra.mrb[6].mxu0 %vm296_vm1, %v1046_v23 }
 0x82e   : > { %v1121_v25 = vpop.f32.mrb[6].mxu0 }
 0x82f   : > { %v1136_v26 = vadd.f32 %v1294_v24, %v1121_v25  ;;  %v1386_v27 = vpop.f32.mrb[7].mxu0 }
 0x831   : > { %1137 = vst.msk [vmem:[#allocation2] sm:$0xff] %vm296_vm1, %v1136_v26 }
 0x838   : > { %v1148_v28 = vld [vmem:[#allocation2] sm:$0xff] }
 0x839   : > { %1149 = vst.msk [vmem:[%s280_s11] sm:$0xff] %vm296_vm1, %v1148_v28 }
 0x83a   : > { %1616 = shalt.err (!%p1613_p11)
}
 0x83b   : > { %s1617_s13 = scalar_lea.hbm %s2028_s10, 128  ;;  %s1621_s24 = scalar_lea.hbm %s2083_s5, 256 }
 0x83c   : > { %p1618_p0 = scmp.ne.s32.totalorder %s2028_s10, %s1617_s13  ;;  %p1622_p6 = scmp.lt.u32.totalorder %s2028_s10, %s2083_s5 }
 0x83d   : > { %p1623_p7 = scmp.lt.u32.totalorder %s1621_s24, %s1617_s13  ;;  %p1625_p8 = scmp.lt.u32.totalorder %s1617_s13, %s2028_s10 }
 0x83e   : > { %p1619_p4 = pnand %p1618_p0, %p2098_p12 }
 0x83f   : > { %p1624_p2 = por %p1623_p7, %p1622_p6 }
 0x840   : > { %p1620_p13 = pneg %p1619_p4 }
 0x841   : > { %p1626_p1 = por %p1625_p8, %p1624_p2 }
 0x843   : > { %p1627_p10 = pnand %p1626_p1, %p1620_p13 }
 0x845   : > { %1630 = shalt.err (!%p1627_p10)
}
 0x846   : > { %1409 = dma.vmem_to_hbm [thread:$0]  (%p2098_p12), %s2030_s15, 128, %s2028_s10, %s1151_s16  }
 0x847 PF: > { %s1176_s11 = sand.u32 1, %s1669_s18   ;;  %p2099_p3 = scmp.ne.s32.totalorder %s2091_s29, 0 }
 0x848   : > { %p2100_p5 = scmp.ge.s32.totalorder %s1689_s23, 2  ;;  %s1177_s27 = scalar_lea.sflag [#allocation5], %s1176_s11 }
 0x84a   : > { %p1423_p9 = pnand %p2100_p5, %p2099_p3 }
 0x84c   : > { %1664 = dma.done.wait (!%p1423_p9), %s1177_s27, 128  }
 0x84d   : > { %1666 = vsyncadd (!%p1423_p9), %s1177_s27, 4294967168  ;;  %s22_s23 = sadd.s32 1, %s1689_s23   ;;  %s2101_s18 = smov %s1673_s19 }
 0x84e   : > { %p19_p11 = scmp.ge.s32.totalorder %s22_s23, 4   ;;  %s2102_s19 = smov %s1677_s20 }
 0x84f   : > { %s2103_s20 = smov %s1886_s6  ;;  %s2104_s21 = smov %s1685_s22 }
 0x850   : > { %s2105_s22 = smov %s2107_s12  ;;  %21 = sbr.rel (!%p19_p11) target bundleno = 7 (0x7), region = 108 }
 0x857   :  { %1182 = vsyncpa [#allocation4], 1 }
 0x858   :  { %1184 = vsyncpa [#allocation4 + $0x1], 1 }
 0x859   :  { %1185 = vsyncpa [#allocation7], 1 }
 0x85a   :  { %1186 = vsyncpa [#allocation5], 1 }
 0x85b   :  { %1188 = vsyncpa [#allocation5 + $0x1], 1 }

</bundles_post_ra>
